<compile_context>
chip_gen: v7x
topology: tpu7x:2x2x1
jax: 0.10.0
libtpu: 0.0.40
codegen_flags: <defaults>
</compile_context>

<pallas_src>
import functools

import jax
import jax.numpy as jnp
from jax import lax
from jax.experimental import pallas as pl
from jax.experimental.pallas import tpu as pltpu


def _round_up(x, m):
    return (x + m - 1) // m * m


# --------------------------- resident-A kernel ------------------------------
def gpr_resident_kernel(temp_ref,      # SMEM (K+1,) gamma coefficients
                        z_ref,         # VMEM (N_pad, OUT_pad) f32
                        a_hbm_ref,     # ANY  (N_pad, N_pad) bf16 (raw HBM ref)
                        o_ref,         # VMEM (N_pad, OUT_pad) f32
                        a_vmem,        # scratch VMEM (N_pad, N_pad) bf16 (single buffer)
                        dma_sem,       # scratch DMA semaphore
                        *, K):
    # One DMA for the whole adjacency (read from HBM exactly once, single-buffered).
    cp = pltpu.make_async_copy(a_hbm_ref, a_vmem, dma_sem)
    cp.start()

    z = z_ref[...]                                   # f32
    hidden0 = temp_ref[0] * z                        # overlap a bit of VPU with the DMA
    cp.wait()

    def body(k, carry):
        xk_bf16, hidden = carry
        xn = jnp.dot(a_vmem[...], xk_bf16,
                     preferred_element_type=jnp.float32)          # bf16 x bf16 -> f32
        hidden = hidden + temp_ref[k + 1] * xn                    # f32 accumulation
        return xn.astype(jnp.bfloat16), hidden

    _, hidden = lax.fori_loop(0, K, body,
                              (z.astype(jnp.bfloat16), hidden0),
                              unroll=(K <= 16))
    o_ref[...] = hidden


# --------------------------- streamed (row-block) kernel ---------------------
def gpr_streamed_kernel(temp_ref,      # SMEM (K+1,)
                        z_ref,         # VMEM (N_pad, OUT_pad) f32  (constant block, fetched once)
                        a_ref,         # VMEM (TM, N_pad) bf16      (row block of A, streamed)
                        o_ref,         # VMEM (TM, OUT_pad) f32
                        xk_ref,        # scratch VMEM (2*N_pad, OUT_pad) bf16  (ping-pong x_k)
                        hid_ref,       # scratch VMEM (N_pad, OUT_pad) f32     (carried hidden)
                        *, tm, n_pad):
    k = pl.program_id(0)               # propagation step (outer, sequential)
    i = pl.program_id(1)               # row block       (inner)
    row = pl.multiple_of(i * tm, tm)

    # Stage x_0 = z into ping-pong slot 0 (once).
    @pl.when(jnp.logical_and(k == 0, i == 0))
    def _():
        xk_ref[pl.ds(0, n_pad), :] = z_ref[...].astype(jnp.bfloat16)

    # hidden init for this row block (once per block).
    @pl.when(k == 0)
    def _():
        hid_ref[pl.ds(row, tm), :] = temp_ref[0] * z_ref[pl.ds(row, tm), :]

    read_base = pl.multiple_of((k % 2) * n_pad, n_pad)
    write_base = pl.multiple_of((1 - (k % 2)) * n_pad, n_pad)

    x_prev = xk_ref[pl.ds(read_base, n_pad), :]                    # (N_pad, OUT_pad) bf16
    x_next = jnp.dot(a_ref[...], x_prev,
                     preferred_element_type=jnp.float32)           # (TM, OUT_pad) f32

    xk_ref[pl.ds(write_base + row, tm), :] = x_next.astype(jnp.bfloat16)
    hid_ref[pl.ds(row, tm), :] = hid_ref[pl.ds(row, tm), :] + temp_ref[k + 1] * x_next

    @pl.when(k == pl.num_programs(0) - 1)
    def _():
        o_ref[...] = hid_ref[pl.ds(row, tm), :]


# ------------------------------- wrappers -----------------------------------
def gpr_propagate(z, A_hat, temp, *, K, tm=None, force_streamed=False,
                  resident_vmem_budget=40 << 20):
    """hidden = sum_k temp[k] * A_hat^k @ z, via Pallas."""
    assert K >= 1
    N, OUT = z.shape
    OUT_pad = _round_up(max(OUT, 128), 128)          # lane-dense propagation slab
    a_bf16 = A_hat.astype(jnp.bfloat16)

    n16 = _round_up(N, 16)
    resident_need = n16 * n16 * 2 + 4 * n16 * OUT_pad * 4   # A(single) + z/out (double)
    use_resident = (not force_streamed) and resident_need <= resident_vmem_budget

    if use_resident:
        N_pad = n16
        z_p = jnp.pad(z, ((0, N_pad - N), (0, OUT_pad - OUT)))
        a_p = jnp.pad(a_bf16, ((0, N_pad - N), (0, N_pad - N)))

        flops = 2 * K * N_pad * N_pad * OUT_pad
        bytes_accessed = N_pad * N_pad * 2 + 2 * N_pad * OUT_pad * 4
        vmem_limit = int(min(max(resident_need + (8 << 20), 16 << 20), 64 << 20))

        grid_spec = pltpu.PrefetchScalarGridSpec(
            num_scalar_prefetch=1,
            grid=(1,),
            in_specs=[
                pl.BlockSpec((N_pad, OUT_pad), lambda i, t: (0, 0)),
                pl.BlockSpec(memory_space=pl.ANY),       # A stays in HBM; one manual DMA
            ],
            out_specs=pl.BlockSpec((N_pad, OUT_pad), lambda i, t: (0, 0)),
            scratch_shapes=[
                pltpu.VMEM((N_pad, N_pad), jnp.bfloat16),    # single-buffered resident A
                pltpu.SemaphoreType.DMA(()),
            ],
        )
        hidden = pl.pallas_call(
            functools.partial(gpr_resident_kernel, K=K),
            out_shape=jax.ShapeDtypeStruct((N_pad, OUT_pad), jnp.float32),
            grid_spec=grid_spec,
            compiler_params=pltpu.CompilerParams(
                dimension_semantics=("arbitrary",),
                vmem_limit_bytes=vmem_limit),
            cost_estimate=pl.CostEstimate(flops=flops, transcendentals=0,
                                          bytes_accessed=bytes_accessed),
        )(temp, z_p, a_p)
        return hidden[:N, :OUT]

    # ---- streamed path: grid = (K, num_row_blocks) ----
    if tm is None:
        tm = 1024
        # keep double-buffered bf16 A row block <= ~24 MiB (v7x 64 MiB VMEM safe)
        while tm > 16 and 2 * tm * _round_up(N, 16) * 2 > (24 << 20):
            tm //= 2
    tm = max(16, _round_up(min(tm, _round_up(N, 16)), 16))
    N_pad = _round_up(N, tm)
    NB = N_pad // tm

    z_p = jnp.pad(z, ((0, N_pad - N), (0, OUT_pad - OUT)))
    a_p = jnp.pad(a_bf16, ((0, N_pad - N), (0, N_pad - N)))

    flops = 2 * K * N_pad * N_pad * OUT_pad
    bytes_accessed = K * N_pad * N_pad * 2 + (K + 1) * N_pad * OUT_pad * 4
    vmem_need = (2 * tm * N_pad * 2 +          # double-buffered A row block (bf16)
                 2 * N_pad * OUT_pad * 4 +     # z block (fetched once, double-buffered)
                 2 * tm * OUT_pad * 4 +        # output block
                 2 * N_pad * OUT_pad * 2 +     # x_k ping-pong scratch (bf16)
                 N_pad * OUT_pad * 4)          # hidden scratch (f32)
    vmem_limit = int(min(max(vmem_need + (8 << 20), 16 << 20), 64 << 20))

    grid_spec = pltpu.PrefetchScalarGridSpec(
        num_scalar_prefetch=1,
        grid=(K, NB),
        in_specs=[
            pl.BlockSpec((N_pad, OUT_pad), lambda k, i, t: (0, 0)),   # z (resident)
            pl.BlockSpec((tm, N_pad), lambda k, i, t: (i, 0)),        # A row block
        ],
        out_specs=pl.BlockSpec((tm, OUT_pad), lambda k, i, t: (i, 0)),
        scratch_shapes=[
            pltpu.VMEM((2 * N_pad, OUT_pad), jnp.bfloat16),   # x_k ping-pong
            pltpu.VMEM((N_pad, OUT_pad), jnp.float32),        # hidden accumulator
        ],
    )
    hidden = pl.pallas_call(
        functools.partial(gpr_streamed_kernel, tm=tm, n_pad=N_pad),
        out_shape=jax.ShapeDtypeStruct((N_pad, OUT_pad), jnp.float32),
        grid_spec=grid_spec,
        compiler_params=pltpu.CompilerParams(
            dimension_semantics=("arbitrary", "arbitrary"),
            vmem_limit_bytes=vmem_limit),
        cost_estimate=pl.CostEstimate(flops=flops, transcendentals=0,
                                      bytes_accessed=bytes_accessed),
    )(temp, z_p, a_p)
    return hidden[:N, :OUT]


def gpr_net_forward(x, A_hat, w1, b1, w2, b2, temp, *, K, tm=None, force_streamed=False):
    # Tiny MLP hoisted to plain XLA (negligible flops; frees kernel VMEM/plumbing).
    z = jnp.maximum(x @ w1 + b1, 0.0) @ w2 + b2
    return gpr_propagate(z.astype(jnp.float32), A_hat, temp, K=K, tm=tm,
                         force_streamed=force_streamed)


# ------------------------------- JAX glue ------------------------------------
def gcn_norm_dense(edge_index, num_nodes):
    """Dense GCN-normalized adjacency with self-loops (edge weight 1):
    A_hat[dst, src] = d_dst^{-1/2} * d_src^{-1/2}, matching gcn_norm(aggr='add')."""
    src, dst = edge_index[0], edge_index[1]
    loop = jnp.arange(num_nodes, dtype=src.dtype)
    src = jnp.concatenate([src, loop])
    dst = jnp.concatenate([dst, loop])
    w = jnp.ones(src.shape[0], dtype=jnp.float32)
    deg = jnp.zeros((num_nodes,), jnp.float32).at[dst].add(w)
    dinv = jnp.where(deg > 0, 1.0 / jnp.sqrt(deg), 0.0)
    norm = dinv[src] * w * dinv[dst]
    A = jnp.zeros((num_nodes, num_nodes), jnp.float32).at[dst, src].add(norm)
    return A


def ppr_temp(K, alpha):
    temp = alpha * (1.0 - alpha) ** jnp.arange(K + 1, dtype=jnp.float32)
    temp = temp.at[-1].set((1.0 - alpha) ** K)
    return temp


def reference_forward(x, A_hat, w1, b1, w2, b2, temp, K):
    h = jnp.maximum(x @ w1 + b1, 0.0)
    z = h @ w2 + b2
    hidden = temp[0] * z
    xk = z
    for k in range(K):
        xk = A_hat @ xk
        hidden = hidden + temp[k + 1] * xk
    return hidden


# --------------------------------- main ---------------------------------------
if __name__ == "__main__":
    def build(key, N, FIN, HID, OUT, E):
        kx, ke1, ke2, kw1, kb1, kw2, kb2 = jax.random.split(key, 7)
        x = jax.random.normal(kx, (N, FIN), dtype=jnp.float32)
        edge_index = jnp.stack([
            jax.random.randint(ke1, (E,), 0, N, dtype=jnp.int32),
            jax.random.randint(ke2, (E,), 0, N, dtype=jnp.int32),
        ])
        bnd1 = 1.0 / jnp.sqrt(jnp.float32(FIN))
        w1 = jax.random.uniform(kw1, (FIN, HID), jnp.float32, -bnd1, bnd1)
        b1 = jax.random.uniform(kb1, (1, HID), jnp.float32, -bnd1, bnd1)
        bnd2 = 1.0 / jnp.sqrt(jnp.float32(HID))
        w2 = jax.random.uniform(kw2, (HID, OUT), jnp.float32, -bnd2, bnd2)
        b2 = jax.random.uniform(kb2, (1, OUT), jnp.float32, -bnd2, bnd2)
        return x, edge_index, w1, b1, w2, b2

    key = jax.random.PRNGKey(0)
    k1, k2 = jax.random.split(key)

    K, alpha = 10, 0.1
    temp = ppr_temp(K, alpha)

    FIN, HID, OUT = 16, 32, 8
    TOL = 3e-2   # A_hat / x_k quantized to bf16 inside the kernel; accumulation is f32.

    # --- Case 1: small graph -> VMEM-resident-A path (A read once, single-buffered) ---
    N1, E1 = 16, 40
    x1, ei1, w1a, b1a, w2a, b2a = build(k1, N1, FIN, HID, OUT, E1)
    A1 = gcn_norm_dense(ei1, N1)
    out1 = jax.block_until_ready(gpr_net_forward(x1, A1, w1a, b1a, w2a, b2a, temp, K=K))
    ref1 = reference_forward(x1, A1, w1a, b1a, w2a, b2a, temp, K)
    assert out1.shape == (N1, OUT)
    assert jnp.allclose(out1, ref1, rtol=TOL, atol=TOL), "resident path mismatch"

    # --- Case 2: larger graph, force the streamed row-block path (grid=(K, N//TM)) ---
    N2, E2 = 256, 1024
    x2, ei2, w1b, b1b, w2b, b2b = build(k2, N2, FIN, HID, OUT, E2)
    A2 = gcn_norm_dense(ei2, N2)
    out2 = jax.block_until_ready(
        gpr_net_forward(x2, A2, w1b, b1b, w2b, b2b, temp, K=K,
                        force_streamed=True, tm=64))
    ref2 = reference_forward(x2, A2, w1b, b1b, w2b, b2b, temp, K)
    assert out2.shape == (N2, OUT)
    assert jnp.allclose(out2, ref2, rtol=TOL, atol=TOL), "streamed path mismatch"

    print("KERNEL_OK")
</pallas_src>

<mosaic_0001>
module attributes {stable_mosaic.version = 11 : i64} {
  func.func @gpr_resident_kernel(%arg0: i32, %arg1: memref<11xf32, #tpu.memory_space<smem>>, %arg2: memref<16x128xf32, #tpu.memory_space<vmem>>, %arg3: memref<16x16xbf16, #tpu.memory_space<any>>, %arg4: memref<16x128xf32, #tpu.memory_space<vmem>>, %arg5: memref<16x16xbf16, #tpu.memory_space<vmem>>, %arg6: memref<!tpu.dma_semaphore, #tpu.memory_space<semaphore_mem>>) attributes {dimension_semantics = [#tpu.dimension_semantics<arbitrary>], iteration_bounds = array<i64: 1>, scalar_prefetch = 1 : i64, scratch_operands = 2 : i64, tpu.core_type = #tpu.core_type<tc>, window_params = [{pipeline_mode = #tpu.pipeline_mode<synchronous>, transform_indices = @transform_0, window_bounds = array<i64: 16, 128>}, {}, {pipeline_mode = #tpu.pipeline_mode<synchronous>, transform_indices = @transform_2, window_bounds = array<i64: 16, 128>}]} {
    tpu.enqueue_dma source(%arg3 : memref<16x16xbf16, #tpu.memory_space<any>>) target(%arg5 : memref<16x16xbf16, #tpu.memory_space<vmem>>) target_semaphore(%arg6 : memref<!tpu.dma_semaphore, #tpu.memory_space<semaphore_mem>>)
    %c0 = arith.constant 0 : index
    %c0_0 = arith.constant 0 : index
    %0 = vector.load %arg2[%c0, %c0_0] : memref<16x128xf32, #tpu.memory_space<vmem>>, vector<16x128xf32>
    %c0_1 = arith.constant 0 : index
    %1 = memref.load %arg1[%c0_1] : memref<11xf32, #tpu.memory_space<smem>>
    %2 = vector.broadcast %1 : f32 to vector<16x128xf32>
    %3 = arith.mulf %2, %0 : vector<16x128xf32>
    tpu.wait_dma2 semaphore(%arg6 : memref<!tpu.dma_semaphore, #tpu.memory_space<semaphore_mem>>) src(%arg3 : memref<16x16xbf16, #tpu.memory_space<any>>) dst(%arg5 : memref<16x16xbf16, #tpu.memory_space<vmem>>)
    %4 = arith.truncf %0 : vector<16x128xf32> to vector<16x128xbf16>
    %c0_i32 = arith.constant 0 : i32
    %c0_2 = arith.constant 0 : index
    %c0_3 = arith.constant 0 : index
    %5 = vector.load %arg5[%c0_2, %c0_3] : memref<16x16xbf16, #tpu.memory_space<vmem>>, vector<16x16xbf16>
    %cst = arith.constant dense<0.000000e+00> : vector<16x128xf32>
    %6 = tpu.matmul %5, %4, %cst {dimension_numbers = #tpu.dot_dimension_numbers<[1], [0], [0], [1], [0, 0, 1, 1], [], []>} : vector<16x16xbf16>, vector<16x128xbf16>, vector<16x128xf32> -> vector<16x128xf32>
    %c1_i32 = arith.constant 1 : i32
    %7 = arith.addi %c0_i32, %c1_i32 : i32
    %8 = arith.index_cast %7 : i32 to index
    %9 = memref.load %arg1[%8] : memref<11xf32, #tpu.memory_space<smem>>
    %10 = vector.broadcast %9 : f32 to vector<16x128xf32>
    %11 = arith.mulf %10, %6 : vector<16x128xf32>
    %12 = arith.addf %3, %11 : vector<16x128xf32>
    %13 = arith.truncf %6 : vector<16x128xf32> to vector<16x128xbf16>
    %c1_i32_4 = arith.constant 1 : i32
    %c0_5 = arith.constant 0 : index
    %c0_6 = arith.constant 0 : index
    %14 = vector.load %arg5[%c0_5, %c0_6] : memref<16x16xbf16, #tpu.memory_space<vmem>>, vector<16x16xbf16>
    %cst_7 = arith.constant dense<0.000000e+00> : vector<16x128xf32>
    %15 = tpu.matmul %14, %13, %cst_7 {dimension_numbers = #tpu.dot_dimension_numbers<[1], [0], [0], [1], [0, 0, 1, 1], [], []>} : vector<16x16xbf16>, vector<16x128xbf16>, vector<16x128xf32> -> vector<16x128xf32>
    %c1_i32_8 = arith.constant 1 : i32
    %16 = arith.addi %c1_i32_4, %c1_i32_8 : i32
    %17 = arith.index_cast %16 : i32 to index
    %18 = memref.load %arg1[%17] : memref<11xf32, #tpu.memory_space<smem>>
    %19 = vector.broadcast %18 : f32 to vector<16x128xf32>
    %20 = arith.mulf %19, %15 : vector<16x128xf32>
    %21 = arith.addf %12, %20 : vector<16x128xf32>
    %22 = arith.truncf %15 : vector<16x128xf32> to vector<16x128xbf16>
    %c2_i32 = arith.constant 2 : i32
    %c0_9 = arith.constant 0 : index
    %c0_10 = arith.constant 0 : index
    %23 = vector.load %arg5[%c0_9, %c0_10] : memref<16x16xbf16, #tpu.memory_space<vmem>>, vector<16x16xbf16>
    %cst_11 = arith.constant dense<0.000000e+00> : vector<16x128xf32>
    %24 = tpu.matmul %23, %22, %cst_11 {dimension_numbers = #tpu.dot_dimension_numbers<[1], [0], [0], [1], [0, 0, 1, 1], [], []>} : vector<16x16xbf16>, vector<16x128xbf16>, vector<16x128xf32> -> vector<16x128xf32>
    %c1_i32_12 = arith.constant 1 : i32
    %25 = arith.addi %c2_i32, %c1_i32_12 : i32
    %26 = arith.index_cast %25 : i32 to index
    %27 = memref.load %arg1[%26] : memref<11xf32, #tpu.memory_space<smem>>
    %28 = vector.broadcast %27 : f32 to vector<16x128xf32>
    %29 = arith.mulf %28, %24 : vector<16x128xf32>
    %30 = arith.addf %21, %29 : vector<16x128xf32>
    %31 = arith.truncf %24 : vector<16x128xf32> to vector<16x128xbf16>
    %c3_i32 = arith.constant 3 : i32
    %c0_13 = arith.constant 0 : index
    %c0_14 = arith.constant 0 : index
    %32 = vector.load %arg5[%c0_13, %c0_14] : memref<16x16xbf16, #tpu.memory_space<vmem>>, vector<16x16xbf16>
    %cst_15 = arith.constant dense<0.000000e+00> : vector<16x128xf32>
    %33 = tpu.matmul %32, %31, %cst_15 {dimension_numbers = #tpu.dot_dimension_numbers<[1], [0], [0], [1], [0, 0, 1, 1], [], []>} : vector<16x16xbf16>, vector<16x128xbf16>, vector<16x128xf32> -> vector<16x128xf32>
    %c1_i32_16 = arith.constant 1 : i32
    %34 = arith.addi %c3_i32, %c1_i32_16 : i32
    %35 = arith.index_cast %34 : i32 to index
    %36 = memref.load %arg1[%35] : memref<11xf32, #tpu.memory_space<smem>>
    %37 = vector.broadcast %36 : f32 to vector<16x128xf32>
    %38 = arith.mulf %37, %33 : vector<16x128xf32>
    %39 = arith.addf %30, %38 : vector<16x128xf32>
    %40 = arith.truncf %33 : vector<16x128xf32> to vector<16x128xbf16>
    %c4_i32 = arith.constant 4 : i32
    %c0_17 = arith.constant 0 : index
    %c0_18 = arith.constant 0 : index
    %41 = vector.load %arg5[%c0_17, %c0_18] : memref<16x16xbf16, #tpu.memory_space<vmem>>, vector<16x16xbf16>
    %cst_19 = arith.constant dense<0.000000e+00> : vector<16x128xf32>
    %42 = tpu.matmul %41, %40, %cst_19 {dimension_numbers = #tpu.dot_dimension_numbers<[1], [0], [0], [1], [0, 0, 1, 1], [], []>} : vector<16x16xbf16>, vector<16x128xbf16>, vector<16x128xf32> -> vector<16x128xf32>
    %c1_i32_20 = arith.constant 1 : i32
    %43 = arith.addi %c4_i32, %c1_i32_20 : i32
    %44 = arith.index_cast %43 : i32 to index
    %45 = memref.load %arg1[%44] : memref<11xf32, #tpu.memory_space<smem>>
    %46 = vector.broadcast %45 : f32 to vector<16x128xf32>
    %47 = arith.mulf %46, %42 : vector<16x128xf32>
    %48 = arith.addf %39, %47 : vector<16x128xf32>
    %49 = arith.truncf %42 : vector<16x128xf32> to vector<16x128xbf16>
    %c5_i32 = arith.constant 5 : i32
    %c0_21 = arith.constant 0 : index
    %c0_22 = arith.constant 0 : index
    %50 = vector.load %arg5[%c0_21, %c0_22] : memref<16x16xbf16, #tpu.memory_space<vmem>>, vector<16x16xbf16>
    %cst_23 = arith.constant dense<0.000000e+00> : vector<16x128xf32>
    %51 = tpu.matmul %50, %49, %cst_23 {dimension_numbers = #tpu.dot_dimension_numbers<[1], [0], [0], [1], [0, 0, 1, 1], [], []>} : vector<16x16xbf16>, vector<16x128xbf16>, vector<16x128xf32> -> vector<16x128xf32>
    %c1_i32_24 = arith.constant 1 : i32
    %52 = arith.addi %c5_i32, %c1_i32_24 : i32
    %53 = arith.index_cast %52 : i32 to index
    %54 = memref.load %arg1[%53] : memref<11xf32, #tpu.memory_space<smem>>
    %55 = vector.broadcast %54 : f32 to vector<16x128xf32>
    %56 = arith.mulf %55, %51 : vector<16x128xf32>
    %57 = arith.addf %48, %56 : vector<16x128xf32>
    %58 = arith.truncf %51 : vector<16x128xf32> to vector<16x128xbf16>
    %c6_i32 = arith.constant 6 : i32
    %c0_25 = arith.constant 0 : index
    %c0_26 = arith.constant 0 : index
    %59 = vector.load %arg5[%c0_25, %c0_26] : memref<16x16xbf16, #tpu.memory_space<vmem>>, vector<16x16xbf16>
    %cst_27 = arith.constant dense<0.000000e+00> : vector<16x128xf32>
    %60 = tpu.matmul %59, %58, %cst_27 {dimension_numbers = #tpu.dot_dimension_numbers<[1], [0], [0], [1], [0, 0, 1, 1], [], []>} : vector<16x16xbf16>, vector<16x128xbf16>, vector<16x128xf32> -> vector<16x128xf32>
    %c1_i32_28 = arith.constant 1 : i32
    %61 = arith.addi %c6_i32, %c1_i32_28 : i32
    %62 = arith.index_cast %61 : i32 to index
    %63 = memref.load %arg1[%62] : memref<11xf32, #tpu.memory_space<smem>>
    %64 = vector.broadcast %63 : f32 to vector<16x128xf32>
    %65 = arith.mulf %64, %60 : vector<16x128xf32>
    %66 = arith.addf %57, %65 : vector<16x128xf32>
    %67 = arith.truncf %60 : vector<16x128xf32> to vector<16x128xbf16>
    %c7_i32 = arith.constant 7 : i32
    %c0_29 = arith.constant 0 : index
    %c0_30 = arith.constant 0 : index
    %68 = vector.load %arg5[%c0_29, %c0_30] : memref<16x16xbf16, #tpu.memory_space<vmem>>, vector<16x16xbf16>
    %cst_31 = arith.constant dense<0.000000e+00> : vector<16x128xf32>
    %69 = tpu.matmul %68, %67, %cst_31 {dimension_numbers = #tpu.dot_dimension_numbers<[1], [0], [0], [1], [0, 0, 1, 1], [], []>} : vector<16x16xbf16>, vector<16x128xbf16>, vector<16x128xf32> -> vector<16x128xf32>
    %c1_i32_32 = arith.constant 1 : i32
    %70 = arith.addi %c7_i32, %c1_i32_32 : i32
    %71 = arith.index_cast %70 : i32 to index
    %72 = memref.load %arg1[%71] : memref<11xf32, #tpu.memory_space<smem>>
    %73 = vector.broadcast %72 : f32 to vector<16x128xf32>
    %74 = arith.mulf %73, %69 : vector<16x128xf32>
    %75 = arith.addf %66, %74 : vector<16x128xf32>
    %76 = arith.truncf %69 : vector<16x128xf32> to vector<16x128xbf16>
    %c8_i32 = arith.constant 8 : i32
    %c0_33 = arith.constant 0 : index
    %c0_34 = arith.constant 0 : index
    %77 = vector.load %arg5[%c0_33, %c0_34] : memref<16x16xbf16, #tpu.memory_space<vmem>>, vector<16x16xbf16>
    %cst_35 = arith.constant dense<0.000000e+00> : vector<16x128xf32>
    %78 = tpu.matmul %77, %76, %cst_35 {dimension_numbers = #tpu.dot_dimension_numbers<[1], [0], [0], [1], [0, 0, 1, 1], [], []>} : vector<16x16xbf16>, vector<16x128xbf16>, vector<16x128xf32> -> vector<16x128xf32>
    %c1_i32_36 = arith.constant 1 : i32
    %79 = arith.addi %c8_i32, %c1_i32_36 : i32
    %80 = arith.index_cast %79 : i32 to index
    %81 = memref.load %arg1[%80] : memref<11xf32, #tpu.memory_space<smem>>
    %82 = vector.broadcast %81 : f32 to vector<16x128xf32>
    %83 = arith.mulf %82, %78 : vector<16x128xf32>
    %84 = arith.addf %75, %83 : vector<16x128xf32>
    %85 = arith.truncf %78 : vector<16x128xf32> to vector<16x128xbf16>
    %c9_i32 = arith.constant 9 : i32
    %c0_37 = arith.constant 0 : index
    %c0_38 = arith.constant 0 : index
    %86 = vector.load %arg5[%c0_37, %c0_38] : memref<16x16xbf16, #tpu.memory_space<vmem>>, vector<16x16xbf16>
    %cst_39 = arith.constant dense<0.000000e+00> : vector<16x128xf32>
    %87 = tpu.matmul %86, %85, %cst_39 {dimension_numbers = #tpu.dot_dimension_numbers<[1], [0], [0], [1], [0, 0, 1, 1], [], []>} : vector<16x16xbf16>, vector<16x128xbf16>, vector<16x128xf32> -> vector<16x128xf32>
    %c1_i32_40 = arith.constant 1 : i32
    %88 = arith.addi %c9_i32, %c1_i32_40 : i32
    %89 = arith.index_cast %88 : i32 to index
    %90 = memref.load %arg1[%89] : memref<11xf32, #tpu.memory_space<smem>>
    %91 = vector.broadcast %90 : f32 to vector<16x128xf32>
    %92 = arith.mulf %91, %87 : vector<16x128xf32>
    %93 = arith.addf %84, %92 : vector<16x128xf32>
    %94 = arith.truncf %87 : vector<16x128xf32> to vector<16x128xbf16>
    %c10_i32 = arith.constant 10 : i32
    %c0_41 = arith.constant 0 : index
    %c0_42 = arith.constant 0 : index
    %95 = vector.load %arg4[%c0_41, %c0_42] : memref<16x128xf32, #tpu.memory_space<vmem>>, vector<16x128xf32>
    tpu.vector_store %arg4[%c0_41, %c0_42], %93 {strides = array<i32>} : memref<16x128xf32, #tpu.memory_space<vmem>>, vector<16x128xf32>,
    return
  }
  func.func @transform_0(%arg0: i32, %arg1: memref<11xf32, #tpu.memory_space<smem>>) -> (i32, i32) {
    %c0_i32 = arith.constant 0 : i32
    %c0_i32_0 = arith.constant 0 : i32
    %c0_i32_1 = arith.constant 0 : i32
    return %c0_i32, %c0_i32_0 : i32, i32
  }
  func.func @transform_2(%arg0: i32, %arg1: memref<11xf32, #tpu.memory_space<smem>>) -> (i32, i32) {
    %c0_i32 = arith.constant 0 : i32
    %c0_i32_0 = arith.constant 0 : i32
    %c0_i32_1 = arith.constant 0 : i32
    return %c0_i32, %c0_i32_0 : i32, i32
  }
}

</mosaic_0001>

<bundles_post_ra>
// kernel: tpu_custom_call.1
= control target key start
LH: loop header
LB: loop body
LE: loop exit
PB: predicated region body
PF: predicated region fallthrough
CT: control target
= control target key end

     0   :  { %s888_s0 = inlined_call_operand.hbm [shape: f32[11], index: 0, kind: input, shape index: {}]   ;;  %s889_s1 = inlined_call_operand.hbm [shape: f32[16,128], index: 1, kind: input, shape index: {}]   ;;  %s890_s2 = inlined_call_operand.hbm [shape: bf16[16,16], index: 2, kind: input, shape index: {}]   ;;  %s891_s3 = inlined_call_operand.hbm [shape: f32[16,128], index: 3, kind: output, shape index: {}]  }
   0x1   :  { %s670_s14 = scalar_lea.hbm %s888_s0, 16 }
   0x2   :  { %p671_p0 = scmp.ne.s32.totalorder %s888_s0, %s670_s14  ;;  %p674_p1 = scmp.lt.u32.totalorder %s670_s14, %s888_s0 }
   0x4   :  { %p676_p2 = pnand %p674_p1, %p671_p0 }
   0x6   :  { %679 = shalt.err (!%p676_p2)  }
   0x7   :  { %s754_s19 = smov [#allocation5]  }
   0x8   :  { %9 = dma.hbm_to_smem %s888_s0, 16, %s754_s19, [#allocation4] }
   0x9   :  { %746 = dma.done.wait [#allocation4], 16 }
   0xa   :  { %747 = vsyncadd [#allocation4], 4294967280 }
   0xb   :  { %11 = sfence }
   0xc   :  { %12 = vsyncpa [#allocation7], 0 }
   0xd   :  { %13 = vsyncpa [#allocation8], 0  ;;  %s755_s22 = smov [#allocation6]   ;;  %s680_s26 = scalar_lea.hbm %s889_s1, 256 }
   0xe   :  { %s19_s23 = sshll.u32 %s755_s22, 4  ;;  %p681_p3 = scmp.ne.s32.totalorder %s889_s1, %s680_s26  ;;  %s20_s23 = int_to_ptr.vmem [resolvable:$true] %s19_s23 }
   0xf   :  { %p684_p4 = scmp.lt.u32.totalorder %s680_s26, %s889_s1 }
  0x11   :  { %p686_p5 = pnand %p684_p4, %p681_p3 }
  0x13   :  { %689 = shalt.err (!%p686_p5)
}
  0x14   :  { %s690_s0 = scalar_lea.vmem %s20_s23, 256  ;;  %p695_p7 = scmp.lt.s32.totalorder %s20_s23, %s20_s23 }
  0x15   :  { %p691_p6 = scmp.ne.s32.totalorder %s20_s23, %s690_s0  ;;  %p696_p8 = scmp.lt.s32.totalorder %s690_s0, %s690_s0 }
  0x17   :  { %p697_p9 = por %p696_p8, %p695_p7 }
  0x19   :  { %p698_p10 = pnand %p697_p9, %p691_p6 }
  0x1b   :  { %701 = shalt.err (!%p698_p10)
}
  0x1c   :  { %s756_s4 = smov 128   ;;  %s757_s5 = smov 8  }
  0x1d   :  { %25 = dma.hbm_to_vmem [thread:$0]  %s889_s1, 256, %s20_s23, [#allocation7], %s756_s4, %s756_s4, %s757_s5  }
  0x1e   :  { %748 = dma.done.wait [#allocation7], 256  }
  0x1f   :  { %749 = vsyncadd [#allocation7], 4294967040  ;;  %s43_s8 = sld [smem:[#allocation5]]  ;;  %s758_s9 = smov [#allocation2]  }
  0x20   :  { %s37_s10 = sshll.u32 %s758_s9, 4  ;;  %s702_s13 = scalar_lea.hbm %s890_s2, 128  ;;  %s38_s10 = int_to_ptr.vmem [resolvable:$true] %s37_s10 }
  0x21   :  { %p703_p11 = scmp.ne.s32.totalorder %s890_s2, %s702_s13  ;;  %p706_p12 = scmp.lt.u32.totalorder %s702_s13, %s890_s2 }
  0x23   :  { %p708_p13 = pnand %p706_p12, %p703_p11 }
  0x25   :  { %711 = shalt.err (!%p708_p13)  }
  0x26   :  { %s712_s1 = scalar_lea.vmem %s38_s10, 128  ;;  %p717_p1 = scmp.lt.s32.totalorder %s38_s10, %s38_s10 }
  0x27   :  { %p713_p0 = scmp.ne.s32.totalorder %s38_s10, %s712_s1  ;;  %p718_p2 = scmp.lt.s32.totalorder %s712_s1, %s712_s1 }
  0x29   :  { %p719_p3 = por %p718_p2, %p717_p1 }
  0x2b   :  { %p720_p4 = pnand %p719_p3, %p713_p0 }
  0x2d   :  { %723 = shalt.err (!%p720_p4)  }
  0x2e   :  { %40 = dma.hbm_to_vmem [thread:$0]  %s890_s2, 128, %s38_s10, [#allocation3]  ;;  %v41_v0 = vld [vmem:[#allocation6] sm:$0xff]  ;;  %v42_v1 = vld [vmem:[#allocation6 + $0x8] sm:$0xff]  ;;  %v44_v2 = vstv %s43_s8 }
  0x2f   :  { %v45_v3 = vmul.f32 %v44_v2, %v41_v0  ;;  %v46_v4 = vmul.f32 %v44_v2, %v42_v1 }
  0x30   :  { %750 = dma.done.wait [#allocation3], 128 }
  0x31   :  { %751 = vsyncadd [#allocation3], 4294967168  ;;  %v51_v5 = vpack.c.bf16 %v42_v1, %v41_v0  ;;  %v759_v6 = vmov 0.0   ;;  %vm760_vm0 = vmmov 0   ;;  %vm53_vm1 = vcmask 130048   ;;  %v828_v7 = vld [vmem:[#allocation2] sm:$0xff] }
  0x32   :  { %602 = vmatprep.subr.bf16.mxu0 %v759_v6  ;;  %604 = vmatprep.mubr.msk.bf16.mxu0 %vm760_vm0, %v759_v6  ;;  %s562_s2 = sld [smem:[#allocation5 + $0x1]]  ;;  %s564_s20 = sld [smem:[#allocation5 + $0x2]] }
  0x33   :  { %603 = vmatpush3.bf16.msra.mxu0 %v51_v5  ;;  %608 = vmatprep.subr.bf16.mxu1 %v759_v6  ;;  %s566_s21 = sld [smem:[#allocation5 + $0x3]]  ;;  %s568_s22 = sld [smem:[#allocation5 + $0x4]] }
  0x34   :  { %610 = vmatprep.mubr.msk.bf16.mxu1 %vm760_vm0, %v759_v6  ;;  %614 = vmatprep.subr.bf16.mxu0 %v759_v6  ;;  %s570_s23 = sld [smem:[#allocation5 + $0x5]]  ;;  %s572_s24 = sld [smem:[#allocation5 + $0x6]] }
  0x35   :  { %s574_s25 = sld [smem:[#allocation5 + $0x7]]  ;;  %s576_s26 = sld [smem:[#allocation5 + $0x8]] }
  0x36   :  { %605 = vmatmul.mubr.msk.bf16.vlgmr.msra.gmra.mrb[0].mxu0 %vm53_vm1, %v828_v7  ;;  %s578_s27 = sld [smem:[#allocation5 + $0x9]]  ;;  %s580_s28 = sld [smem:[#allocation5 + $0xa]] }
  0x37   :  { %616 = vmatprep.mubr.msk.bf16.mxu0 %vm760_vm0, %v759_v6  ;;  %s761_s29 = smov [#allocation9]  }
  0x38   :  { %v99_v13 = vstv %s562_s2  ;;  %v147_v15 = vstv %s564_s20  ;;  %s543_s30 = sshll.u32 %s761_s29, 4  ;;  %s544_s30 = int_to_ptr.vmem [resolvable:$true] %s543_s30 }
  0x39   :  { %v195_v28 = vstv %s566_s21  ;;  %v243_v38 = vstv %s568_s22  ;;  %s724_s0 = scalar_lea.vmem %s544_s30, 256  ;;  %p729_p6 = scmp.lt.s32.totalorder %s544_s30, %s544_s30 }
  0x3a   :  { %v291_v48 = vstv %s570_s23  ;;  %v339_v58 = vstv %s572_s24  ;;  %p725_p5 = scmp.ne.s32.totalorder %s544_s30, %s724_s0  ;;  %p730_p7 = scmp.lt.s32.totalorder %s724_s0, %s724_s0 }
  0x3c   :  { %p731_p8 = por %p730_p7, %p729_p6 }
  0x3e   :  { %p732_p9 = pnand %p731_p8, %p725_p5 }
 0x109   :  { %v91_v8 = vpop.f32.mrb[0].mxu0 }
 0x10a   :  { %v606_v9 = vpop.f32.mrb[1].mxu0  ;;  %v100_v14 = vmul.f32 %v99_v13, %v91_v8 }
 0x10b   :  { %v94_v10 = vpop.f32.mrb[2].mxu0 }
 0x10c   :  { %v607_v11 = vpop.f32.mrb[3].mxu0  ;;  %v104_v12 = vpack.c.bf16 %v94_v10, %v91_v8  ;;  %v101_v16 = vmul.f32 %v99_v13, %v94_v10  ;;  %v102_v18 = vadd.f32 %v100_v14, %v45_v3 }
 0x10e   :  { %609 = vmatpush3.bf16.msra.mxu1 %v104_v12  ;;  %v103_v22 = vadd.f32 %v101_v16, %v46_v4  ;;  %v387_v4 = vstv %s574_s25  ;;  %v435_v16 = vstv %s576_s26 }
 0x10f   :  { %620 = vmatprep.subr.bf16.mxu1 %v759_v6 }
 0x111   :  { %611 = vmatmul.mubr.msk.bf16.vlgmr.msra.gmra.mrb[0].mxu1 %vm53_vm1, %v828_v7 }
 0x112   :  { %622 = vmatprep.mubr.msk.bf16.mxu1 %vm760_vm0, %v759_v6 }
 0x1e4   :  { %v139_v17 = vpop.f32.mrb[0].mxu1 }
 0x1e5   :  { %v148_v19 = vmul.f32 %v147_v15, %v139_v17  ;;  %v612_v20 = vpop.f32.mrb[1].mxu1 }
 0x1e6   :  { %v142_v21 = vpop.f32.mrb[2].mxu1 }
 0x1e7   :  { %v150_v23 = vadd.f32 %v148_v19, %v102_v18  ;;  %v149_v24 = vmul.f32 %v147_v15, %v142_v21  ;;  %v152_v25 = vpack.c.bf16 %v142_v21, %v139_v17  ;;  %v613_v26 = vpop.f32.mrb[3].mxu1 }
 0x1e8   :  { %v483_v26 = vstv %s578_s27 }
 0x1e9   :  { %v151_v27 = vadd.f32 %v149_v24, %v103_v22  ;;  %615 = vmatpush3.bf16.msra.mxu0 %v152_v25 }
 0x1ea   :  { %626 = vmatprep.subr.bf16.mxu0 %v759_v6 }
 0x1ec   :  { %617 = vmatmul.mubr.msk.bf16.vlgmr.msra.gmra.mrb[4].mxu0 %vm53_vm1, %v828_v7 }
 0x1ed   :  { %628 = vmatprep.mubr.msk.bf16.mxu0 %vm760_vm0, %v759_v6 }
 0x2bf   :  { %v187_v29 = vpop.f32.mrb[4].mxu0 }
 0x2c0   :  { %v196_v30 = vmul.f32 %v195_v28, %v187_v29  ;;  %v618_v31 = vpop.f32.mrb[5].mxu0 }
 0x2c1   :  { %v190_v32 = vpop.f32.mrb[6].mxu0 }
 0x2c2   :  { %v198_v33 = vadd.f32 %v196_v30, %v150_v23  ;;  %v197_v34 = vmul.f32 %v195_v28, %v190_v32  ;;  %v200_v35 = vpack.c.bf16 %v190_v32, %v187_v29  ;;  %v619_v36 = vpop.f32.mrb[7].mxu0 }
 0x2c4   :  { %v199_v37 = vadd.f32 %v197_v34, %v151_v27  ;;  %621 = vmatpush3.bf16.msra.mxu1 %v200_v35  ;;  %v531_v35 = vstv %s580_s28 }
 0x2c5   :  { %632 = vmatprep.subr.bf16.mxu1 %v759_v6 }
 0x2c7   :  { %623 = vmatmul.mubr.msk.bf16.vlgmr.msra.gmra.mrb[4].mxu1 %vm53_vm1, %v828_v7 }
 0x2c8   :  { %634 = vmatprep.mubr.msk.bf16.mxu1 %vm760_vm0, %v759_v6 }
 0x39a   :  { %v235_v39 = vpop.f32.mrb[4].mxu1 }
 0x39b   :  { %v244_v40 = vmul.f32 %v243_v38, %v235_v39  ;;  %v624_v41 = vpop.f32.mrb[5].mxu1 }
 0x39c   :  { %v238_v42 = vpop.f32.mrb[6].mxu1 }
 0x39d   :  { %v246_v43 = vadd.f32 %v244_v40, %v198_v33  ;;  %v245_v44 = vmul.f32 %v243_v38, %v238_v42  ;;  %v248_v45 = vpack.c.bf16 %v238_v42, %v235_v39  ;;  %v625_v46 = vpop.f32.mrb[7].mxu1 }
 0x39f   :  { %v247_v47 = vadd.f32 %v245_v44, %v199_v37  ;;  %627 = vmatpush3.bf16.msra.mxu0 %v248_v45 }
 0x3a0   :  { %638 = vmatprep.subr.bf16.mxu0 %v759_v6 }
 0x3a2   :  { %629 = vmatmul.mubr.msk.bf16.vlgmr.msra.gmra.mrb[8].mxu0 %vm53_vm1, %v828_v7 }
 0x3a3   :  { %640 = vmatprep.mubr.msk.bf16.mxu0 %vm760_vm0, %v759_v6 }
 0x475   :  { %v283_v49 = vpop.f32.mrb[8].mxu0 }
 0x476   :  { %v292_v50 = vmul.f32 %v291_v48, %v283_v49  ;;  %v630_v51 = vpop.f32.mrb[9].mxu0 }
 0x477   :  { %v286_v52 = vpop.f32.mrb[10].mxu0 }
 0x478   :  { %v294_v53 = vadd.f32 %v292_v50, %v246_v43  ;;  %v293_v54 = vmul.f32 %v291_v48, %v286_v52  ;;  %v296_v55 = vpack.c.bf16 %v286_v52, %v283_v49  ;;  %v631_v56 = vpop.f32.mrb[11].mxu0 }
 0x47a   :  { %v295_v57 = vadd.f32 %v293_v54, %v247_v47  ;;  %633 = vmatpush3.bf16.msra.mxu1 %v296_v55 }
 0x47b   :  { %644 = vmatprep.subr.bf16.mxu1 %v759_v6 }
 0x47d   :  { %635 = vmatmul.mubr.msk.bf16.vlgmr.msra.gmra.mrb[8].mxu1 %vm53_vm1, %v828_v7 }
 0x47e   :  { %646 = vmatprep.mubr.msk.bf16.mxu1 %vm760_vm0, %v759_v6 }
 0x550   :  { %v331_v59 = vpop.f32.mrb[8].mxu1 }
 0x551   :  { %v340_v60 = vmul.f32 %v339_v58, %v331_v59  ;;  %v636_v61 = vpop.f32.mrb[9].mxu1 }
 0x552   :  { %v334_v62 = vpop.f32.mrb[10].mxu1 }
 0x553   :  { %v342_v63 = vadd.f32 %v340_v60, %v294_v53  ;;  %v341_v0 = vmul.f32 %v339_v58, %v334_v62  ;;  %v344_v1 = vpack.c.bf16 %v334_v62, %v331_v59  ;;  %v637_v2 = vpop.f32.mrb[11].mxu1 }
 0x555   :  { %v343_v3 = vadd.f32 %v341_v0, %v295_v57  ;;  %639 = vmatpush3.bf16.msra.mxu0 %v344_v1 }
 0x556   :  { %650 = vmatprep.subr.bf16.mxu0 %v759_v6 }
 0x558   :  { %641 = vmatmul.mubr.msk.bf16.vlgmr.msra.gmra.mrb[12].mxu0 %vm53_vm1, %v828_v7 }
 0x559   :  { %652 = vmatprep.mubr.msk.bf16.mxu0 %vm760_vm0, %v759_v6 }
 0x62b   :  { %v379_v5 = vpop.f32.mrb[12].mxu0 }
 0x62c   :  { %v388_v8 = vmul.f32 %v387_v4, %v379_v5  ;;  %v642_v9 = vpop.f32.mrb[13].mxu0 }
 0x62d   :  { %v382_v10 = vpop.f32.mrb[14].mxu0 }
 0x62e   :  { %v390_v11 = vadd.f32 %v388_v8, %v342_v63  ;;  %v389_v12 = vmul.f32 %v387_v4, %v382_v10  ;;  %v392_v13 = vpack.c.bf16 %v382_v10, %v379_v5  ;;  %v643_v14 = vpop.f32.mrb[15].mxu0 }
 0x630   :  { %v391_v15 = vadd.f32 %v389_v12, %v343_v3  ;;  %645 = vmatpush3.bf16.msra.mxu1 %v392_v13 }
 0x631   :  { %656 = vmatprep.subr.bf16.mxu1 %v759_v6 }
 0x633   :  { %647 = vmatmul.mubr.msk.bf16.vlgmr.msra.gmra.mrb[12].mxu1 %vm53_vm1, %v828_v7 }
 0x634   :  { %658 = vmatprep.mubr.msk.bf16.mxu1 %vm760_vm0, %v759_v6 }
 0x706   :  { %v427_v17 = vpop.f32.mrb[12].mxu1 }
 0x707   :  { %v436_v18 = vmul.f32 %v435_v16, %v427_v17  ;;  %v648_v19 = vpop.f32.mrb[13].mxu1 }
 0x708   :  { %v430_v20 = vpop.f32.mrb[14].mxu1 }
 0x709   :  { %v438_v21 = vadd.f32 %v436_v18, %v390_v11  ;;  %v437_v22 = vmul.f32 %v435_v16, %v430_v20  ;;  %v440_v23 = vpack.c.bf16 %v430_v20, %v427_v17  ;;  %v649_v24 = vpop.f32.mrb[15].mxu1 }
 0x70b   :  { %v439_v25 = vadd.f32 %v437_v22, %v391_v15  ;;  %651 = vmatpush3.bf16.msra.mxu0 %v440_v23 }
 0x70e   :  { %653 = vmatmul.mubr.msk.bf16.vlgmr.msra.gmra.mrb[16].mxu0 %vm53_vm1, %v828_v7 }
 0x7e1   :  { %v475_v27 = vpop.f32.mrb[16].mxu0 }
 0x7e2   :  { %v484_v28 = vmul.f32 %v483_v26, %v475_v27  ;;  %v654_v6 = vpop.f32.mrb[17].mxu0 }
 0x7e3   :  { %v478_v29 = vpop.f32.mrb[18].mxu0 }
 0x7e4   :  { %v486_v30 = vadd.f32 %v484_v28, %v438_v21  ;;  %v485_v31 = vmul.f32 %v483_v26, %v478_v29  ;;  %v488_v32 = vpack.c.bf16 %v478_v29, %v475_v27  ;;  %v655_v33 = vpop.f32.mrb[19].mxu0 }
 0x7e6   :  { %v487_v34 = vadd.f32 %v485_v31, %v439_v25  ;;  %657 = vmatpush3.bf16.msra.mxu1 %v488_v32 }
 0x7e9   :  { %659 = vmatmul.mubr.msk.bf16.vlgmr.msra.gmra.mrb[16].mxu1 %vm53_vm1, %v828_v7 }
 0x8bc   :  { %v523_v36 = vpop.f32.mrb[16].mxu1 }
 0x8bd   :  { %v532_v37 = vmul.f32 %v531_v35, %v523_v36  ;;  %v660_v38 = vpop.f32.mrb[17].mxu1 }
 0x8be   :  { %v526_v39 = vpop.f32.mrb[18].mxu1 }
 0x8bf   :  { %v534_v40 = vadd.f32 %v532_v37, %v486_v30  ;;  %v533_v41 = vmul.f32 %v531_v35, %v526_v39  ;;  %v661_v42 = vpop.f32.mrb[19].mxu1 }
 0x8c1   :  { %536 = vst [vmem:[#allocation9] sm:$0xff] %v534_v40  ;;  %v535_v43 = vadd.f32 %v533_v41, %v487_v34 }
 0x8c3   :  { %537 = vst [vmem:[#allocation9 + $0x8] sm:$0xff] %v535_v43 }
 0x8c4   :  { %735 = shalt.err (!%p732_p9)
}
 0x8c5   :  { %s736_s8 = scalar_lea.hbm %s891_s3, 256 }
 0x8c6   :  { %p737_p10 = scmp.ne.s32.totalorder %s891_s3, %s736_s8  ;;  %p740_p11 = scmp.lt.u32.totalorder %s736_s8, %s891_s3 }
 0x8c8   :  { %p742_p12 = pnand %p740_p11, %p737_p10 }
 0x8ca   :  { %745 = shalt.err (!%p742_p12)
}
 0x8cb   :  { %549 = dma.vmem_to_hbm [thread:$0]  %s544_s30, 256, %s891_s3, [#allocation8], %s756_s4, %s756_s4, %s757_s5  }
 0x8cc   :  { %752 = dma.done.wait [#allocation8], 256  }
 0x8cd   :  { %753 = vsyncadd [#allocation8], 4294967040 }
 0x8ce   :  { %553 = vsyncpa [#allocation7], 1 }
 0x8cf   :  { %554 = vsyncpa [#allocation8], 1 }
 0x8d0   :  { %555 = vsyncmov [#allocation3] }
 0x8d3   :  { %s556_s15 = vpop.sfrf %555 }
 0x8d4   :  { %p581_p13 = scmp.ne.s32.totalorder %s556_s15, 0 }
 0x8d6   :  { %560 = shalt.err (%p581_p13)  }

</bundles_post_ra>
